<compile_context>
chip_gen: v7x
topology: tpu7x:2x2x1
jax: 0.10.0
libtpu: 0.0.40
codegen_flags: <defaults>
</compile_context>

<pallas_src>
import jax
import jax.numpy as jnp
from jax.experimental import pallas as pl
from jax.experimental.pallas import tpu as pltpu

LANE = 128
SUBLANE = 8


def _round_up(x, m):
    return (x + m - 1) // m * m


def _pad2d(x, rows, cols):
    r, c = x.shape
    if r == rows and c == cols:
        return x
    return jnp.pad(x, ((0, rows - r), (0, cols - c)))


# ----------------------------------------------------------------------------
# Fused Pallas kernel: (folded post_emb+post_cat) * up_dim(union) @ cls + bias
# Grid = (row_tiles [parallel], pooling_dim slabs [arbitrary/reduction]).
# ----------------------------------------------------------------------------
def _fused_rel_kernel(
    ctx_h_ref, ctx_t_ref, union_ref, fbias_ref,        # row inputs
    weff_h_ref, weff_t_ref, beff_ref,                   # streamed P-slabs
    wup_ref, bup_ref,
    wcls_ref,
    bcls_ref,                                           # grid-invariant
    o_ref,
    acc_ref,                                            # f32 logits accumulator
):
    f32 = jnp.float32
    p = pl.program_id(1)

    @pl.when(p == 0)
    def _():
        acc_ref[...] = jnp.zeros_like(acc_ref)

    # folded post_emb+post_cat on this pooling-dim slab: bf16 operands, f32 acc
    prod = (jnp.dot(ctx_h_ref[...], weff_h_ref[...], preferred_element_type=f32)
            + jnp.dot(ctx_t_ref[...], weff_t_ref[...], preferred_element_type=f32)
            + beff_ref[...])
    # use_vision & union_single_not_match branch: prod * up_dim(union)
    union_up = (jnp.dot(union_ref[...], wup_ref[...], preferred_element_type=f32)
                + bup_ref[...])
    fused = (prod * union_up).astype(jnp.bfloat16)      # elementwise in f32
    # partial contribution of this pooling slab to the last-group classifier
    acc_ref[...] += jnp.dot(fused, wcls_ref[...], preferred_element_type=f32)

    @pl.when(p == pl.num_programs(1) - 1)
    def _():
        o_ref[...] = (acc_ref[...] + bcls_ref[...] + fbias_ref[...]).astype(o_ref.dtype)


def _max_row_tile():
    # v5e MXU is 4x128x128 -> 128-row tiles already fill M; v6e/v7x MXU is
    # 2x256x256 -> 256-row tiles double MXU occupancy and halve grid steps.
    try:
        kind = jax.devices()[0].device_kind.lower()
    except Exception:
        return 256
    if "v5 lite" in kind or "v5e" in kind or "v5litepod" in kind:
        return 128
    return 256


def _vmem_capacity_bytes():
    try:
        return int(pltpu.get_tpu_info().vmem_capacity_bytes)
    except Exception:
        return 64 * 1024 * 1024   # conservative: v7x per-TC VMEM


def _pick_p_tile(ppad):
    # largest lane-multiple slab <= 512 that divides the padded pooling dim
    for t in (512, 256, 128):
        if ppad % t == 0:
            return t
    return ppad


def _vmem_limit_bytes(row_tile, hpad, dpad, p_tile, cpad):
    bf, f4 = 2, 4
    # streamed weight slabs per pooling step (double-buffered by the pipeline)
    w_step = (2 * hpad * p_tile * bf + p_tile * f4     # w_eff_h/t + b_eff
              + dpad * p_tile * bf + p_tile * f4       # w_up + b_up
              + p_tile * cpad * bf)                    # w_cls slab
    # per-row-tile activations / outputs (double-buffered)
    rows = (row_tile * (2 * hpad + dpad) * bf          # ctx_h, ctx_t, union
            + row_tile * cpad * f4                     # fbias
            + row_tile * cpad * f4)                    # output block
    need = (2 * (w_step + rows)                        # double buffers
            + cpad * f4                                # b_cls
            + row_tile * cpad * f4                     # acc scratch
            + (8 << 20))                               # headroom for spills
    cap = int(_vmem_capacity_bytes() * 0.9)
    return int(min(max(need, 32 * 1024 * 1024), cap))


def pallas_fused_rel_dists(ctx_head, ctx_tail, union, fbias, pp, num_rel_cls):
    """ctx_head/ctx_tail: (N, H), union: (N, Dmlp), fbias: (N, C); pp: padded params."""
    n = ctx_head.shape[0]
    hpad = pp["w_eff_h"].shape[0]
    dpad = pp["w_up"].shape[0]
    ppad = pp["w_cls"].shape[0]
    cpad = pp["w_cls"].shape[1]
    p_tile = _pick_p_tile(ppad)

    # Big row tiles amortize the ~0.35us/grid-step overhead and fill MXU rows;
    # cap so the (parallel) row grid keeps >= 2 steps for v7x's 2 TensorCores.
    max_tile = _max_row_tile()
    row_tile = max(SUBLANE, min(max_tile, _round_up(max(-(-n // 2), 1), SUBLANE)))
    n_pad = _round_up(max(n, row_tile), row_tile)

    bf16 = jnp.bfloat16
    args = (
        _pad2d(ctx_head, n_pad, hpad).astype(bf16),
        _pad2d(ctx_tail, n_pad, hpad).astype(bf16),
        _pad2d(union, n_pad, dpad).astype(bf16),
        _pad2d(fbias, n_pad, cpad),                    # f32 (elementwise add)
        pp["w_eff_h"], pp["w_eff_t"], pp["b_eff"],
        pp["w_up"], pp["b_up"], pp["w_cls"], pp["b_cls"],
    )

    def row_spec(cols):
        return pl.BlockSpec((row_tile, cols), lambda i, p: (i, 0))

    grid = (n_pad // row_tile, ppad // p_tile)

    out = pl.pallas_call(
        _fused_rel_kernel,
        out_shape=jax.ShapeDtypeStruct((n_pad, cpad), jnp.float32),
        grid_spec=pltpu.PrefetchScalarGridSpec(
            num_scalar_prefetch=0,
            grid=grid,
            in_specs=[
                row_spec(hpad), row_spec(hpad), row_spec(dpad), row_spec(cpad),
                pl.BlockSpec((hpad, p_tile), lambda i, p: (0, p)),
                pl.BlockSpec((hpad, p_tile), lambda i, p: (0, p)),
                pl.BlockSpec((1, p_tile), lambda i, p: (0, p)),
                pl.BlockSpec((dpad, p_tile), lambda i, p: (0, p)),
                pl.BlockSpec((1, p_tile), lambda i, p: (0, p)),
                pl.BlockSpec((p_tile, cpad), lambda i, p: (p, 0)),
                pl.BlockSpec((1, cpad), lambda i, p: (0, 0)),
            ],
            out_specs=pl.BlockSpec((row_tile, cpad), lambda i, p: (i, 0)),
            scratch_shapes=[pltpu.VMEM((row_tile, cpad), jnp.float32)],
        ),
        compiler_params=pltpu.CompilerParams(
            dimension_semantics=("parallel", "arbitrary"),
            vmem_limit_bytes=_vmem_limit_bytes(row_tile, hpad, dpad, p_tile, cpad),
        ),
    )(*args)

    # slice off row padding and lane padding (padded logits columns are exact zeros
    # of the padded weights, and padded rows are discarded)
    return out[:n, :num_rel_cls]


# ----------------------------------------------------------------------------
# Parameter construction (deterministic, synthetic — no checkpoint)
# ----------------------------------------------------------------------------
def make_params(key, hidden_dim, pooling_dim, mlp_head_dim, num_rel_cls):
    ks = jax.random.split(key, 4)

    def xavier(k, fan_in, fan_out):
        lim = (6.0 / (fan_in + fan_out)) ** 0.5
        return jax.random.uniform(k, (fan_in, fan_out), jnp.float32, -lim, lim)

    std = 10.0 * (1.0 / hidden_dim) ** 0.5
    return {
        "w_emb": std * jax.random.normal(ks[0], (hidden_dim, 2 * hidden_dim), jnp.float32),
        "b_emb": jnp.zeros((1, 2 * hidden_dim), jnp.float32),
        "w_cat": xavier(ks[1], 2 * hidden_dim, pooling_dim),
        "b_cat": jnp.zeros((1, pooling_dim), jnp.float32),
        "w_up": xavier(ks[2], mlp_head_dim, pooling_dim),     # union_single_not_match
        "b_up": jnp.zeros((1, pooling_dim), jnp.float32),
        "w_cls": xavier(ks[3], pooling_dim, num_rel_cls),     # last (full) group cls
        "b_cls": jnp.zeros((1, num_rel_cls), jnp.float32),
    }


def pad_params(params, hidden_dim, mlp_head_dim, pooling_dim, num_rel_cls):
    """Fold post_emb into post_cat, pad to lane multiples, cast matmul weights to bf16."""
    hpad = _round_up(hidden_dim, LANE)
    dpad = _round_up(mlp_head_dim, LANE)
    ppad = _round_up(pooling_dim, LANE)
    cpad = _round_up(num_rel_cls, LANE)
    h = hidden_dim

    # Exact fold (MotifsLike_GCL has no activation between post_emb and post_cat):
    #   prod = head @ Wc_h + tail @ Wc_t, head = ctx @ We_h + be_h, ...
    #   => prod = ctx @ (We_h @ Wc_h) + ctx @ (We_t @ Wc_t) + b_eff
    w_emb_h, w_emb_t = params["w_emb"][:, :h], params["w_emb"][:, h:]
    b_emb_h, b_emb_t = params["b_emb"][:, :h], params["b_emb"][:, h:]
    w_cat_h, w_cat_t = params["w_cat"][:h], params["w_cat"][h:]
    w_eff_h = w_emb_h @ w_cat_h
    w_eff_t = w_emb_t @ w_cat_t
    b_eff = b_emb_h @ w_cat_h + b_emb_t @ w_cat_t + params["b_cat"]

    bf16 = jnp.bfloat16
    return {
        # MXU weights in bf16 (f32 accumulation in-kernel)
        "w_eff_h": _pad2d(w_eff_h, hpad, ppad).astype(bf16),
        "w_eff_t": _pad2d(w_eff_t, hpad, ppad).astype(bf16),
        "w_up":    _pad2d(params["w_up"], dpad, ppad).astype(bf16),
        "w_cls":   _pad2d(params["w_cls"], ppad, cpad).astype(bf16),
        # biases stay f32 (elementwise adds)
        "b_eff":   _pad2d(b_eff, 1, ppad),
        "b_up":    _pad2d(params["b_up"], 1, ppad),
        "b_cls":   _pad2d(params["b_cls"], 1, cpad),
    }


# ----------------------------------------------------------------------------
# Forward pass (eval branch of MotifsLike_GCL.forward)
# ----------------------------------------------------------------------------
def motifs_like_gcl_forward(
    padded_params,
    obj_dists,        # (N_obj, num_obj_cls)   from context layer
    obj_preds,        # (N_obj,) int32         from context layer
    edge_ctx,         # (N_obj, hidden_dim)    from context layer
    rel_pair_idxs,    # list of (num_rel_i, 2) int32, indices local to each image
    union_features,   # (N_rel, mlp_head_dim)
    freq_bias_table,  # (num_obj_cls*num_obj_cls, num_rel_cls)
    num_objs,         # python list[int]
    num_rels,         # python list[int]
    num_obj_cls,
):
    # --- per-pair index gathers (XLA glue; data-dependent indices) ----------
    sub_list, obj_list = [], []
    off = 0
    for pair_idx, n_o in zip(rel_pair_idxs, num_objs):
        sub_list.append(pair_idx[:, 0] + off)
        obj_list.append(pair_idx[:, 1] + off)
        off += n_o
    sub_all = jnp.concatenate(sub_list, axis=0)
    obj_all = jnp.concatenate(obj_list, axis=0)

    ctx_head = edge_ctx[sub_all]                     # (N_rel, H)
    ctx_tail = edge_ctx[obj_all]                     # (N_rel, H)
    pair_sub = obj_preds[sub_all]
    pair_obj = obj_preds[obj_all]
    fb_idx = pair_sub * num_obj_cls + pair_obj       # FrequencyBias_GCL.index_with_labels
    fbias_rows = freq_bias_table[fb_idx]             # (N_rel, C)

    num_rel_cls = freq_bias_table.shape[1]
    rel_dists = pallas_fused_rel_dists(
        ctx_head, ctx_tail, union_features, fbias_rows, padded_params, num_rel_cls)

    # --- per-image splits (glue) --------------------------------------------
    rel_splits, obj_splits = [], []
    r_off, o_off = 0, 0
    for nr in num_rels:
        rel_splits.append(rel_dists[r_off:r_off + nr])
        r_off += nr
    for no in num_objs:
        obj_splits.append(obj_dists[o_off:o_off + no])
        o_off += no
    add_losses = {}
    return obj_splits, rel_splits, add_losses


# pure-JAX f32 reference (mirrors the PyTorch eval branch) for correctness check
def reference_forward(params, edge_ctx, rel_pair_idxs, union_features,
                      obj_preds, freq_bias_table, num_objs, num_obj_cls, hidden_dim):
    edge_rep = edge_ctx @ params["w_emb"] + params["b_emb"]
    head_rep = edge_rep[:, :hidden_dim]
    tail_rep = edge_rep[:, hidden_dim:]
    off = 0
    prod_reps, pair_preds = [], []
    for pair_idx, n in zip(rel_pair_idxs, num_objs):
        sub = pair_idx[:, 0] + off
        obj = pair_idx[:, 1] + off
        prod_reps.append(jnp.concatenate([head_rep[sub], tail_rep[obj]], axis=-1))
        pair_preds.append(jnp.stack([obj_preds[sub], obj_preds[obj]], axis=1))
        off += n
    prod_raw = jnp.concatenate(prod_reps, axis=0)
    pair_pred = jnp.concatenate(pair_preds, axis=0)
    prod = prod_raw @ params["w_cat"] + params["b_cat"]
    prod = prod * (union_features @ params["w_up"] + params["b_up"])
    logits = prod @ params["w_cls"] + params["b_cls"]
    fb = freq_bias_table[pair_pred[:, 0] * num_obj_cls + pair_pred[:, 1]]
    return logits + fb


if __name__ == "__main__":
    # small shapes consistent with the module config
    hidden_dim = 32        # CONTEXT_HIDDEN_DIM
    pooling_dim = 64       # CONTEXT_POOLING_DIM
    mlp_head_dim = 48      # ROI_BOX_HEAD.MLP_HEAD_DIM (!= pooling_dim -> up_dim path)
    num_obj_cls = 10
    num_rel_cls = 16       # output width of the last (full) group classifier
    num_objs = [7, 9]      # 2 images (uneven on purpose: exercises row padding)
    num_rels = [10, 7]
    n_obj = sum(num_objs)
    n_rel = sum(num_rels)

    key = jax.random.PRNGKey(0)
    k_par, k_ctx, k_dst, k_prd, k_pair, k_uni, k_fb = jax.random.split(key, 7)

    params = make_params(k_par, hidden_dim, pooling_dim, mlp_head_dim, num_rel_cls)
    padded = pad_params(params, hidden_dim, mlp_head_dim, pooling_dim, num_rel_cls)

    # synthetic context-layer outputs
    edge_ctx = jax.random.normal(k_ctx, (n_obj, hidden_dim), jnp.float32)
    obj_dists = jax.random.normal(k_dst, (n_obj, num_obj_cls), jnp.float32)
    obj_preds = jax.random.randint(k_prd, (n_obj,), 0, num_obj_cls, jnp.int32)

    # per-image relation pairs (local object indices)
    rel_pair_idxs = []
    kk = k_pair
    for n_o, n_r in zip(num_objs, num_rels):
        kk, sub = jax.random.split(kk)
        rel_pair_idxs.append(jax.random.randint(sub, (n_r, 2), 0, n_o, jnp.int32))

    union_features = jax.random.normal(k_uni, (n_rel, mlp_head_dim), jnp.float32)
    freq_bias_table = 0.1 * jax.random.normal(
        k_fb, (num_obj_cls * num_obj_cls, num_rel_cls), jnp.float32)

    obj_out, rel_out, add_losses = motifs_like_gcl_forward(
        padded, obj_dists, obj_preds, edge_ctx, rel_pair_idxs,
        union_features, freq_bias_table, num_objs, num_rels, num_obj_cls)
    rel_all = jnp.concatenate(rel_out, axis=0)
    jax.block_until_ready(rel_all)

    ref = reference_forward(params, edge_ctx, rel_pair_idxs, union_features,
                            obj_preds, freq_bias_table, num_objs, num_obj_cls,
                            hidden_dim)
    assert rel_all.shape == (n_rel, num_rel_cls)
    # kernel uses bf16 matmul operands (f32 accumulation) -> bf16-scale tolerance
    max_err = float(jnp.max(jnp.abs(rel_all - ref)))
    scale = float(jnp.max(jnp.abs(ref))) + 1e-6
    assert max_err <= 0.05 * scale + 1e-3, f"mismatch vs reference: {max_err} (scale {scale})"
    assert len(obj_out) == 2 and obj_out[0].shape == (num_objs[0], num_obj_cls)

    print("KERNEL_OK")
</pallas_src>

<mosaic_0001>
module attributes {stable_mosaic.version = 11 : i64} {
  func.func @_fused_rel_kernel(%arg0: i32, %arg1: i32, %arg2: memref<16x128xbf16, #tpu.memory_space<vmem>>, %arg3: memref<16x128xbf16, #tpu.memory_space<vmem>>, %arg4: memref<16x128xbf16, #tpu.memory_space<vmem>>, %arg5: memref<16x128xf32, #tpu.memory_space<vmem>>, %arg6: memref<128x128xbf16, #tpu.memory_space<vmem>>, %arg7: memref<128x128xbf16, #tpu.memory_space<vmem>>, %arg8: memref<1x128xf32, #tpu.memory_space<vmem>>, %arg9: memref<128x128xbf16, #tpu.memory_space<vmem>>, %arg10: memref<1x128xf32, #tpu.memory_space<vmem>>, %arg11: memref<128x128xbf16, #tpu.memory_space<vmem>>, %arg12: memref<1x128xf32, #tpu.memory_space<vmem>>, %arg13: memref<16x128xf32, #tpu.memory_space<vmem>>, %arg14: memref<16x128xf32, #tpu.memory_space<vmem>>) attributes {dimension_semantics = [#tpu.dimension_semantics<parallel>, #tpu.dimension_semantics<arbitrary>], iteration_bounds = array<i64: 2, 1>, scalar_prefetch = 0 : i64, scratch_operands = 1 : i64, tpu.core_type = #tpu.core_type<tc>, window_params = [{transform_indices = @transform_0, window_bounds = array<i64: 16, 128>}, {transform_indices = @transform_1, window_bounds = array<i64: 16, 128>}, {transform_indices = @transform_2, window_bounds = array<i64: 16, 128>}, {transform_indices = @transform_3, window_bounds = array<i64: 16, 128>}, {transform_indices = @transform_4, window_bounds = array<i64: 128, 128>}, {transform_indices = @transform_5, window_bounds = array<i64: 128, 128>}, {transform_indices = @transform_6, window_bounds = array<i64: 1, 128>}, {transform_indices = @transform_7, window_bounds = array<i64: 128, 128>}, {transform_indices = @transform_8, window_bounds = array<i64: 1, 128>}, {transform_indices = @transform_9, window_bounds = array<i64: 128, 128>}, {pipeline_mode = #tpu.pipeline_mode<synchronous>, transform_indices = @transform_10, window_bounds = array<i64: 1, 128>}, {transform_indices = @transform_11, window_bounds = array<i64: 16, 128>}]} {
    %c0_i32 = arith.constant 0 : i32
    %0 = arith.cmpi eq, %arg1, %c0_i32 : i32
    %1 = arith.extui %0 : i1 to i32
    %c0_i32_0 = arith.constant 0 : i32
    %2 = arith.cmpi ne, %1, %c0_i32_0 : i32
    scf.if %2 {
      %cst_27 = arith.constant 0.000000e+00 : f32
      %29 = vector.broadcast %cst_27 : f32 to vector<16x128xf32>
      %c0_28 = arith.constant 0 : index
      %c0_29 = arith.constant 0 : index
      %30 = vector.load %arg14[%c0_28, %c0_29] : memref<16x128xf32, #tpu.memory_space<vmem>>, vector<16x128xf32>
      tpu.vector_store %arg14[%c0_28, %c0_29], %29 {strides = array<i32>} : memref<16x128xf32, #tpu.memory_space<vmem>>, vector<16x128xf32>,
    } else {
    }
    %c0 = arith.constant 0 : index
    %c0_1 = arith.constant 0 : index
    %3 = vector.load %arg2[%c0, %c0_1] : memref<16x128xbf16, #tpu.memory_space<vmem>>, vector<16x128xbf16>
    %c0_2 = arith.constant 0 : index
    %c0_3 = arith.constant 0 : index
    %4 = vector.load %arg6[%c0_2, %c0_3] : memref<128x128xbf16, #tpu.memory_space<vmem>>, vector<128x128xbf16>
    %cst = arith.constant dense<0.000000e+00> : vector<16x128xf32>
    %5 = tpu.matmul %3, %4, %cst {dimension_numbers = #tpu.dot_dimension_numbers<[1], [0], [0], [1], [0, 0, 1, 1], [], []>} : vector<16x128xbf16>, vector<128x128xbf16>, vector<16x128xf32> -> vector<16x128xf32>
    %c0_4 = arith.constant 0 : index
    %c0_5 = arith.constant 0 : index
    %6 = vector.load %arg3[%c0_4, %c0_5] : memref<16x128xbf16, #tpu.memory_space<vmem>>, vector<16x128xbf16>
    %c0_6 = arith.constant 0 : index
    %c0_7 = arith.constant 0 : index
    %7 = vector.load %arg7[%c0_6, %c0_7] : memref<128x128xbf16, #tpu.memory_space<vmem>>, vector<128x128xbf16>
    %cst_8 = arith.constant dense<0.000000e+00> : vector<16x128xf32>
    %8 = tpu.matmul %6, %7, %cst_8 {dimension_numbers = #tpu.dot_dimension_numbers<[1], [0], [0], [1], [0, 0, 1, 1], [], []>} : vector<16x128xbf16>, vector<128x128xbf16>, vector<16x128xf32> -> vector<16x128xf32>
    %9 = arith.addf %5, %8 : vector<16x128xf32>
    %c0_9 = arith.constant 0 : index
    %c0_10 = arith.constant 0 : index
    %10 = vector.load %arg8[%c0_9, %c0_10] : memref<1x128xf32, #tpu.memory_space<vmem>>, vector<1x128xf32>
    %11 = vector.broadcast %10 : vector<1x128xf32> to vector<16x128xf32>
    %12 = arith.addf %9, %11 : vector<16x128xf32>
    %c0_11 = arith.constant 0 : index
    %c0_12 = arith.constant 0 : index
    %13 = vector.load %arg4[%c0_11, %c0_12] : memref<16x128xbf16, #tpu.memory_space<vmem>>, vector<16x128xbf16>
    %c0_13 = arith.constant 0 : index
    %c0_14 = arith.constant 0 : index
    %14 = vector.load %arg9[%c0_13, %c0_14] : memref<128x128xbf16, #tpu.memory_space<vmem>>, vector<128x128xbf16>
    %cst_15 = arith.constant dense<0.000000e+00> : vector<16x128xf32>
    %15 = tpu.matmul %13, %14, %cst_15 {dimension_numbers = #tpu.dot_dimension_numbers<[1], [0], [0], [1], [0, 0, 1, 1], [], []>} : vector<16x128xbf16>, vector<128x128xbf16>, vector<16x128xf32> -> vector<16x128xf32>
    %c0_16 = arith.constant 0 : index
    %c0_17 = arith.constant 0 : index
    %16 = vector.load %arg10[%c0_16, %c0_17] : memref<1x128xf32, #tpu.memory_space<vmem>>, vector<1x128xf32>
    %17 = vector.broadcast %16 : vector<1x128xf32> to vector<16x128xf32>
    %18 = arith.addf %15, %17 : vector<16x128xf32>
    %19 = arith.mulf %12, %18 : vector<16x128xf32>
    %20 = arith.truncf %19 : vector<16x128xf32> to vector<16x128xbf16>
    %c0_18 = arith.constant 0 : index
    %c0_19 = arith.constant 0 : index
    %21 = vector.load %arg14[%c0_18, %c0_19] : memref<16x128xf32, #tpu.memory_space<vmem>>, vector<16x128xf32>
    %c0_20 = arith.constant 0 : index
    %c0_21 = arith.constant 0 : index
    %22 = vector.load %arg11[%c0_20, %c0_21] : memref<128x128xbf16, #tpu.memory_space<vmem>>, vector<128x128xbf16>
    %cst_22 = arith.constant dense<0.000000e+00> : vector<16x128xf32>
    %23 = tpu.matmul %20, %22, %cst_22 {dimension_numbers = #tpu.dot_dimension_numbers<[1], [0], [0], [1], [0, 0, 1, 1], [], []>} : vector<16x128xbf16>, vector<128x128xbf16>, vector<16x128xf32> -> vector<16x128xf32>
    %24 = arith.addf %21, %23 : vector<16x128xf32>
    %c0_23 = arith.constant 0 : index
    %c0_24 = arith.constant 0 : index
    %25 = vector.load %arg14[%c0_23, %c0_24] : memref<16x128xf32, #tpu.memory_space<vmem>>, vector<16x128xf32>
    tpu.vector_store %arg14[%c0_23, %c0_24], %24 {strides = array<i32>} : memref<16x128xf32, #tpu.memory_space<vmem>>, vector<16x128xf32>,
    %c0_i32_25 = arith.constant 0 : i32
    %26 = arith.cmpi eq, %arg1, %c0_i32_25 : i32
    %27 = arith.extui %26 : i1 to i32
    %c0_i32_26 = arith.constant 0 : i32
    %28 = arith.cmpi ne, %27, %c0_i32_26 : i32
    scf.if %28 {
      %c0_27 = arith.constant 0 : index
      %c0_28 = arith.constant 0 : index
      %29 = vector.load %arg14[%c0_27, %c0_28] : memref<16x128xf32, #tpu.memory_space<vmem>>, vector<16x128xf32>
      %c0_29 = arith.constant 0 : index
      %c0_30 = arith.constant 0 : index
      %30 = vector.load %arg12[%c0_29, %c0_30] : memref<1x128xf32, #tpu.memory_space<vmem>>, vector<1x128xf32>
      %31 = vector.broadcast %30 : vector<1x128xf32> to vector<16x128xf32>
      %32 = arith.addf %29, %31 : vector<16x128xf32>
      %c0_31 = arith.constant 0 : index
      %c0_32 = arith.constant 0 : index
      %33 = vector.load %arg5[%c0_31, %c0_32] : memref<16x128xf32, #tpu.memory_space<vmem>>, vector<16x128xf32>
      %34 = arith.addf %32, %33 : vector<16x128xf32>
      %c0_33 = arith.constant 0 : index
      %c0_34 = arith.constant 0 : index
      %35 = vector.load %arg13[%c0_33, %c0_34] : memref<16x128xf32, #tpu.memory_space<vmem>>, vector<16x128xf32>
      tpu.vector_store %arg13[%c0_33, %c0_34], %34 {strides = array<i32>} : memref<16x128xf32, #tpu.memory_space<vmem>>, vector<16x128xf32>,
    } else {
    }
    return
  }
  func.func @transform_0(%arg0: i32, %arg1: i32) -> (i32, i32) {
    %c0_i32 = arith.constant 0 : i32
    %c0_i32_0 = arith.constant 0 : i32
    return %arg0, %c0_i32 : i32, i32
  }
  func.func @transform_1(%arg0: i32, %arg1: i32) -> (i32, i32) {
    %c0_i32 = arith.constant 0 : i32
    %c0_i32_0 = arith.constant 0 : i32
    return %arg0, %c0_i32 : i32, i32
  }
  func.func @transform_2(%arg0: i32, %arg1: i32) -> (i32, i32) {
    %c0_i32 = arith.constant 0 : i32
    %c0_i32_0 = arith.constant 0 : i32
    return %arg0, %c0_i32 : i32, i32
  }
  func.func @transform_3(%arg0: i32, %arg1: i32) -> (i32, i32) {
    %c0_i32 = arith.constant 0 : i32
    %c0_i32_0 = arith.constant 0 : i32
    return %arg0, %c0_i32 : i32, i32
  }
  func.func @transform_4(%arg0: i32, %arg1: i32) -> (i32, i32) {
    %c0_i32 = arith.constant 0 : i32
    %c0_i32_0 = arith.constant 0 : i32
    return %c0_i32, %arg1 : i32, i32
  }
  func.func @transform_5(%arg0: i32, %arg1: i32) -> (i32, i32) {
    %c0_i32 = arith.constant 0 : i32
    %c0_i32_0 = arith.constant 0 : i32
    return %c0_i32, %arg1 : i32, i32
  }
  func.func @transform_6(%arg0: i32, %arg1: i32) -> (i32, i32) {
    %c0_i32 = arith.constant 0 : i32
    %c0_i32_0 = arith.constant 0 : i32
    return %c0_i32, %arg1 : i32, i32
  }
  func.func @transform_7(%arg0: i32, %arg1: i32) -> (i32, i32) {
    %c0_i32 = arith.constant 0 : i32
    %c0_i32_0 = arith.constant 0 : i32
    return %c0_i32, %arg1 : i32, i32
  }
  func.func @transform_8(%arg0: i32, %arg1: i32) -> (i32, i32) {
    %c0_i32 = arith.constant 0 : i32
    %c0_i32_0 = arith.constant 0 : i32
    return %c0_i32, %arg1 : i32, i32
  }
  func.func @transform_9(%arg0: i32, %arg1: i32) -> (i32, i32) {
    %c0_i32 = arith.constant 0 : i32
    %c0_i32_0 = arith.constant 0 : i32
    return %arg1, %c0_i32 : i32, i32
  }
  func.func @transform_10(%arg0: i32, %arg1: i32) -> (i32, i32) {
    %c0_i32 = arith.constant 0 : i32
    %c0_i32_0 = arith.constant 0 : i32
    %c0_i32_1 = arith.constant 0 : i32
    return %c0_i32, %c0_i32_0 : i32, i32
  }
  func.func @transform_11(%arg0: i32, %arg1: i32) -> (i32, i32) {
    %c0_i32 = arith.constant 0 : i32
    %c0_i32_0 = arith.constant 0 : i32
    return %arg0, %c0_i32 : i32, i32
  }
}

</mosaic_0001>

<bundles_post_ra>
// kernel: tpu_custom_call.1
= control target key start
LH: loop header
LB: loop body
LE: loop exit
PB: predicated region body
PF: predicated region fallthrough
CT: control target
= control target key end

     0   :  { %s2666_s0 = inlined_call_operand.hbm [shape: bf16[32,128], index: 0, kind: input, shape index: {}]   ;;  %s2667_s1 = inlined_call_operand.hbm [shape: bf16[32,128], index: 1, kind: input, shape index: {}]   ;;  %s2668_s2 = inlined_call_operand.hbm [shape: bf16[32,128], index: 2, kind: input, shape index: {}]   ;;  %s2669_s3 = inlined_call_operand.hbm [shape: f32[32,128], index: 3, kind: input, shape index: {}]   ;;  %s2670_s4 = inlined_call_operand.hbm [shape: bf16[128,128], index: 4, kind: input, shape index: {}]   ;;  %s2671_s5 = inlined_call_operand.hbm [shape: bf16[128,128], index: 5, kind: input, shape index: {}]   ;;  %s2672_s6 = inlined_call_operand.vmem [shape: f32[1,128], index: 6, kind: input, shape index: {}]   ;;  %s2673_s7 = inlined_call_operand.hbm [shape: bf16[128,128], index: 7, kind: input, shape index: {}]   ;;  %s2674_s8 = inlined_call_operand.vmem [shape: f32[1,128], index: 8, kind: input, shape index: {}]   ;;  %s2675_s9 = inlined_call_operand.hbm [shape: bf16[128,128], index: 9, kind: input, shape index: {}]   ;;  %s2676_s10 = inlined_call_operand.vmem [shape: f32[1,128], index: 10, kind: input, shape index: {}]   ;;  %s2677_s11 = inlined_call_operand.hbm [shape: f32[32,128], index: 11, kind: output, shape index: {}]  }
   0x1   :  { %2704 = sst [smem:[#allocation34_spill]] %s2667_s1 }
   0x2   :  { %2705 = sst [smem:[#allocation35_spill]] %s2670_s4 }
   0x3   :  { %2706 = sst [smem:[#allocation36_spill]] %s2671_s5 }
   0x4   :  { %2707 = sst [smem:[#allocation37_spill]] %s2672_s6 }
   0x5   :  { %2708 = sst [smem:[#allocation38_spill]] %s2674_s8 }
   0x6   :  { %2709 = sst [smem:[#allocation39_spill]] %s2676_s10 }
   0x7   :  { %2710 = sst [smem:[#allocation40_spill]] %s2677_s11 }
   0x8   :  { %16 = vsyncpa [#allocation4], 0 }
   0x9   :  { %18 = vsyncpa [#allocation4 + $0x1], 0 }
   0xa   :  { %19 = vsyncpa [#allocation7], 0 }
   0xb   :  { %21 = vsyncpa [#allocation7 + $0x1], 0 }
   0xc   :  { %22 = vsyncpa [#allocation10], 0 }
   0xd   :  { %24 = vsyncpa [#allocation10 + $0x1], 0 }
   0xe   :  { %25 = vsyncpa [#allocation13], 0 }
   0xf   :  { %26 = vsyncpa [#allocation16], 0 }
  0x10   :  { %27 = vsyncpa [#allocation5], 0 }
  0x11   :  { %29 = vsyncpa [#allocation5 + $0x1], 0  ;;  %s2152_s17 = smov 0   ;;  %s2154_s18 = smov 0  }
  0x12   :  { %s2156_s19 = smov 0   ;;  %s2158_s20 = smov 0  }
  0x13   :  { %s2160_s21 = smov 0   ;;  %s2162_s22 = smov 0  }
  0x14 LB: > { %2711 = sst [smem:[#allocation25_spill]] %s2053_s17  ;;  %s2183_s23 = sadd.s32 4294967295, %s2073_s22   ;;  %s2073_s22 = sphi %s2162_s22, %s35_s22   ;;  %s2069_s21 = sphi %s2160_s21, %s2765_s21   ;;  %s2065_s20 = sphi %s2158_s20, %s2764_s20   ;;  %s2061_s19 = sphi %s2156_s19, %s2760_s19   ;;  %s2057_s18 = sphi %s2154_s18, %s2763_s18   ;;  %s2053_s17 = sphi %s2152_s17, %s2762_s17  }
  0x15   : > { %2712 = sst [smem:[#allocation26_spill]] %s2061_s19  ;;  %s1383_s24 = sadd.s32 4294967294, %s2073_s22  }
  0x16   : > { %2713 = sst [smem:[#allocation27_spill]] %s2065_s20  ;;  %p67_p0 = scmp.ne.s32.totalorder %s2057_s18, %s2053_s17 }
  0x17   : > { %2714 = sst [smem:[#allocation28_spill]] %s2183_s23  ;;  %p2680_p1 = scmp.eq.s32.totalorder %s2183_s23, 0 }
  0x18   : > { %p352_p3 = scmp.eq.s32.totalorder %s1383_s24, 1  ;;  %p1384_p5 = scmp.ge.s32.totalorder %s2073_s22, 1 }
  0x19   : > { %p2192_p4 = por %p2680_p1, %p67_p0  ;;  %p359_p7 = scmp.lt.s32.totalorder %s2073_s22, 3 }
  0x1a   : > { %p2197_p6 = por %p352_p3, %p67_p0  ;;  %s2075_s28 = smov [#allocation11]  }
  0x1b   : > { %s2715_s25 = scalar_select %p2192_p4, 1, 0 }
  0x1c   : > { %s2717_s26 = scalar_select %p2197_p6, 1, 0 }
  0x1d   : > { %2716 = sst [smem:[#allocation29_spill]] %s2715_s25  ;;  %p2202_p8 = pnand %p1384_p5, %p359_p7 }
  0x1e   : > { %2718 = sst [smem:[#allocation30_spill]] %s2717_s26  ;;  %s373_s29 = sshll.u32 %s2075_s28, 4  ;;  %s2206_s29 = int_to_ptr.vmem [resolvable:$true] %s373_s29 }
  0x1f   : > { %s2719_s27 = scalar_select %p2202_p8, 1, 0 }
  0x20   : > { %p1604_p9 = pneg %p2202_p8  ;;  %s2076_s12 = smov [#allocation12]  }
  0x21   : > { %s388_s13 = sshll.u32 %s2076_s12, 4  ;;  %s2721_s4 = sld [smem:[#allocation35_spill]]  ;;  %s2217_s13 = int_to_ptr.vmem [resolvable:$true] %s388_s13 }
  0x22   : > { %p2213_p11 = pnand %p1604_p9, %p2680_p1 }
  0x24   : > { %s2720_s30 = scalar_select %p2213_p11, 1, 0 }
  0x25   : > { %p2227_p13 = pneg %p2213_p11 }
  0x27   : > { %s1739_s16 = scalar_lea.hbm %s2721_s4, 1024 }
  0x28   : > { %p1740_p12 = scmp.ne.s32.totalorder %s2721_s4, %s1739_s16  ;;  %p1746_p5 = scmp.lt.u32.totalorder %s1739_s16, %s2721_s4 }
  0x29   : > { %s2722_s26 = scalar_select %p2227_p13, 1, 0 }
  0x2a   : > { %p1742_p0 = pnand %p2227_p13, %p1740_p12 }
  0x2c   : > { %p1743_p3 = pneg %p1742_p0 }
  0x2e   : > { %p1748_p7 = pnand %p1746_p5, %p1743_p3 }
  0x30   : > { %1751 = shalt.err (!%p1748_p7)
}
  0x31   : > { %s1752_s14 = scalar_lea.vmem %s2206_s29, 1024  ;;  %p1760_p2 = scmp.lt.s32.totalorder %s2206_s29, %s2206_s29 }
  0x32   : > { %p1753_p9 = scmp.ne.s32.totalorder %s2206_s29, %s1752_s14  ;;  %p1761_p6 = scmp.lt.s32.totalorder %s1752_s14, %s1752_s14 }
  0x34   : > { %p1755_p10 = pnand %p1753_p9, %p2227_p13  ;;  %p1762_p12 = por %p1761_p6, %p1760_p2 }
  0x36   : > { %p1756_p1 = pneg %p1755_p10 }
  0x38   : > { %p1763_p0 = pnand %p1762_p12, %p1756_p1 }
  0x3a   : > { %1766 = shalt.err (!%p1763_p0)
}
  0x3b   : > { %s2682_s15 = smov 64   ;;  %s2684_s17 = smov 4  }
  0x3c   : > { %1607 = dma.hbm_to_vmem [thread:$0]  (!%p2213_p11), %s2721_s4, 1024, %s2206_s29, [#allocation10], %s2682_s15, %s2682_s15, %s2684_s17  }
  0x3d   : > { %s2723_s5 = sld [smem:[#allocation36_spill]] }
  0x43   : > { %s1767_s14 = scalar_lea.hbm %s2723_s5, 1024 }
  0x44   : > { %p1768_p1 = scmp.ne.s32.totalorder %s2723_s5, %s1767_s14  ;;  %p1774_p10 = scmp.lt.u32.totalorder %s1767_s14, %s2723_s5 }
  0x46   : > { %p1770_p2 = pnand %p1768_p1, %p2227_p13 }
  0x48   : > { %p1771_p6 = pneg %p1770_p2 }
  0x4a   : > { %p1776_p3 = pnand %p1774_p10, %p1771_p6 }
  0x4c   : > { %1779 = shalt.err (!%p1776_p3)
}
  0x4d   : > { %s1780_s29 = scalar_lea.vmem %s2217_s13, 1024  ;;  %p1788_p12 = scmp.lt.s32.totalorder %s2217_s13, %s2217_s13 }
  0x4e   : > { %p1781_p5 = scmp.ne.s32.totalorder %s2217_s13, %s1780_s29  ;;  %p1789_p0 = scmp.lt.s32.totalorder %s1780_s29, %s1780_s29 }
  0x50   : > { %p1783_p7 = pnand %p1781_p5, %p2227_p13  ;;  %p1790_p1 = por %p1789_p0, %p1788_p12 }
  0x52   : > { %p1784_p9 = pneg %p1783_p7 }
  0x54   : > { %p1791_p2 = pnand %p1790_p1, %p1784_p9 }
  0x56   : > { %1794 = shalt.err (!%p1791_p2)
}
  0x57   : > { %1610 = dma.hbm_to_vmem [thread:$0]  (!%p2213_p11), %s2723_s5, 1024, %s2217_s13, [#allocation13], %s2682_s15, %s2682_s15, %s2684_s17  }
  0x58   : > { %s47_s11 = sadd.s32 1, %s2069_s21  ;;  %s54_s20 = sadd.s32 1, %s2061_s19 }
  0x59   : > { %p49_p6 = scmp.ge.s32.totalorder %s47_s11, 2  ;;  %p61_p10 = scmp.ne.s32.totalorder %s2061_s19, %s2057_s18 }
  0x5a   : > { %p62_p3 = scmp.eq.s32.totalorder %s2073_s22, 0  ;;  %p1638_p5 = scmp.lt.s32.totalorder %s2073_s22, 2 }
  0x5b   : > { %s2767_s11 = smov (%p49_p6, %s47_s11), 0  ;;  %p2725_p9 = scmp.eq.s32.totalorder %s2183_s23, 1 }
  0x5c   : > { %2724 = sst [smem:[#allocation31_spill]] %s2767_s11  ;;  %p63_p7 = por %p62_p3, %p61_p10 }
  0x5d   : > { %p2287_p12 = por %p2725_p9, %p61_p10  ;;  %s51_s24 = ssub.s32 %s2069_s21, %s2767_s11 }
  0x5e   : > { %s2294_s13 = sand.u32 1, %s2061_s19   ;;  %p52_p0 = scmp.eq.s32.totalorder %s51_s24, 0 }
  0x5f   : > { %s2726_s16 = scalar_select %p2287_p12, 1, 0 }
  0x60   : > { %s2297_s28 = sshll.u32 %s2294_s13, 3  ;;  %s2300_s12 = sshll.u32 %s2069_s21, 7 }
  0x61   : > { %2727 = sst [smem:[#allocation32_spill]] %s2726_s16  ;;  %p2302_p1 = pnand %p1638_p5, %p63_p7 }
  0x62   : > { %s2307_s29 = scalar_select %p52_p0, %s2061_s19, %s54_s20  }
  0x63   : > { %s2728_s14 = scalar_select %p2302_p1, 1, 0 }
  0x64   : > { %2729 = sst [smem:[#allocation33_spill]] %s2307_s29  ;;  %s2690_s8 = sand.u32 1, %s2073_s22  }
  0x65   : > { %s2730_s1 = sld [smem:[#allocation34_spill]]  ;;  %s473_s24 = scalar_lea.vmem [#allocation6], %s2297_s28 }
  0x66   : > { %s480_s4 = sshll.u32 %s473_s24, 4  ;;  %s2321_s5 = scalar_lea.sflag [#allocation7], %s2690_s8  ;;  %s2317_s4 = int_to_ptr.vmem [resolvable:$true] %s480_s4 }
  0x67   : > { %p2327_p6 = pneg %p2302_p1 }
  0x6b   : > { %s2314_s17 = scalar_lea.hbm %s2730_s1, %s2300_s12  ;;  %s1800_s24 = scalar_lea.hbm %s2730_s1, 256 }
  0x6c   : > { %s1795_s11 = scalar_lea.hbm %s2314_s17, 128  ;;  %p1801_p5 = scmp.lt.u32.totalorder %s2314_s17, %s2730_s1 }
  0x6d   : > { %p1796_p2 = scmp.ne.s32.totalorder %s2314_s17, %s1795_s11  ;;  %p1802_p7 = scmp.lt.u32.totalorder %s1800_s24, %s1795_s11 }
  0x6e   : > { %p1804_p0 = scmp.lt.u32.totalorder %s1795_s11, %s2314_s17 }
  0x6f   : > { %p1798_p10 = pnand %p2327_p6, %p1796_p2  ;;  %p1803_p9 = por %p1802_p7, %p1801_p5 }
  0x71   : > { %p1799_p3 = pneg %p1798_p10  ;;  %p1805_p12 = por %p1804_p0, %p1803_p9 }
  0x73   : > { %p1806_p4 = pnand %p1805_p12, %p1799_p3 }
  0x75   : > { %1809 = shalt.err (!%p1806_p4)
}
  0x76   : > { %s1810_s8 = scalar_lea.vmem %s2317_s4, 128  ;;  %s2079_s15 = smov [#allocation6]  }
  0x77   : > { %p1811_p2 = scmp.ne.s32.totalorder %s2317_s4, %s1810_s8  ;;  %s1815_s10 = sshll.u32 %s2079_s15, 4  ;;  %s1816_s10 = int_to_ptr.vmem [resolvable:$false] %s1815_s10 }
  0x78   : > { %s1817_s19 = scalar_lea.vmem %s1816_s10, 256  ;;  %p1818_p11 = scmp.lt.s32.totalorder %s2317_s4, %s1816_s10 }
  0x79   : > { %p1813_p10 = pnand %p1811_p2, %p2327_p6  ;;  %p1819_p13 = scmp.lt.s32.totalorder %s1817_s19, %s1810_s8 }
  0x7b   : > { %p1814_p8 = pneg %p1813_p10  ;;  %p1820_p5 = por %p1819_p13, %p1818_p11 }
  0x7d   : > { %p1821_p7 = pnand %p1820_p5, %p1814_p8 }
  0x7f   : > { %1824 = shalt.err (!%p1821_p7)
}
  0x80   : > { %s2732_s11 = smov 4   ;;  %s2733_s29 = smov 64  }
  0x81   : > { %1623 = dma.hbm_to_vmem [thread:$0]  (!%p2302_p1), %s2314_s17, 128, %s2317_s4, %s2321_s5, %s2733_s29, %s2733_s29, %s2732_s11  }
  0x82   : > { %s2080_s24 = smov [#allocation14]   ;;  %s2081_s15 = smov [#allocation15]  }
  0x83   : > { %s409_s1 = sshll.u32 %s2080_s24, 4  ;;  %s431_s16 = sshll.u32 %s2081_s15, 4  ;;  %s410_s1 = int_to_ptr.vmem [resolvable:$true] %s409_s1  ;;  %s2354_s16 = int_to_ptr.vmem [resolvable:$true] %s431_s16 }
  0x84   : > { %s1825_s19 = scalar_lea.hbm %s2673_s7, 1024  ;;  %p2734_p8 = scmp.ne.s32.totalorder %s2722_s26, 0 }
  0x85   : > { %p1826_p4 = scmp.ne.s32.totalorder %s2673_s7, %s1825_s19  ;;  %p1832_p12 = scmp.lt.u32.totalorder %s1825_s19, %s2673_s7 }
  0x87   : > { %p1828_p11 = pnand %p1826_p4, %p2734_p8 }
  0x89   : > { %p1829_p13 = pneg %p1828_p11 }
  0x8b   : > { %p1834_p3 = pnand %p1832_p12, %p1829_p13 }
  0x8d   : > { %1837 = shalt.err (!%p1834_p3)
}
  0x8e   : > { %s1838_s17 = scalar_lea.vmem %s410_s1, 1024  ;;  %p1846_p10 = scmp.lt.s32.totalorder %s410_s1, %s410_s1 }
  0x8f   : > { %p1839_p9 = scmp.ne.s32.totalorder %s410_s1, %s1838_s17  ;;  %p1847_p5 = scmp.lt.s32.totalorder %s1838_s17, %s1838_s17 }
  0x91   : > { %p1841_p0 = pnand %p1839_p9, %p2734_p8  ;;  %p1848_p7 = por %p1847_p5, %p1846_p10 }
  0x93   : > { %p1842_p2 = pneg %p1841_p0 }
  0x95   : > { %p1849_p1 = pnand %p1848_p7, %p1842_p2 }
  0x97   : > { %1852 = shalt.err (!%p1849_p1)
}
  0x98   : > { %p2735_p4 = scmp.ne.s32.totalorder %s2720_s30, 0  ;;  %s1853_s15 = scalar_lea.hbm %s2675_s9, 1024 }
  0x99   : > { %p1854_p11 = scmp.ne.s32.totalorder %s2675_s9, %s1853_s15  ;;  %p1860_p12 = scmp.lt.u32.totalorder %s1853_s15, %s2675_s9 }
  0x9a   : > { %1613 = dma.hbm_to_vmem [thread:$0]  (!%p2735_p4), %s2673_s7, 1024, %s410_s1, [#allocation13], %s2733_s29, %s2733_s29, %s2732_s11  }
  0x9b   : > { %p1856_p1 = pnand %p1854_p11, %p2734_p8 }
  0x9d   : > { %p1857_p13 = pneg %p1856_p1 }
  0x9f   : > { %p1862_p3 = pnand %p1860_p12, %p1857_p13 }
  0xa1   : > { %1865 = shalt.err (!%p1862_p3)
}
  0xa2   : > { %s1866_s1 = scalar_lea.vmem %s2354_s16, 1024  ;;  %p1874_p10 = scmp.lt.s32.totalorder %s2354_s16, %s2354_s16 }
  0xa3   : > { %p1867_p9 = scmp.ne.s32.totalorder %s2354_s16, %s1866_s1  ;;  %p1875_p5 = scmp.lt.s32.totalorder %s1866_s1, %s1866_s1 }
  0xa5   : > { %p1869_p0 = pnand %p1867_p9, %p2734_p8  ;;  %p1876_p7 = por %p1875_p5, %p1874_p10 }
  0xa7   : > { %p1870_p2 = pneg %p1869_p0 }
  0xa9   : > { %p1877_p11 = pnand %p1876_p7, %p1870_p2 }
  0xab   : > { %1880 = shalt.err (!%p1877_p11)
}
  0xac   : > { %1616 = dma.hbm_to_vmem [thread:$0]  (!%p2735_p4), %s2675_s9, 1024, %s2354_s16, [#allocation16], %s2733_s29, %s2733_s29, %s2732_s11  }
  0xad   : > { %s2407_s25 = scalar_lea.hbm %s2666_s0, %s2300_s12  ;;  %s452_s30 = scalar_lea.vmem [#allocation3], %s2297_s28 }
  0xae   : > { %s459_s24 = sshll.u32 %s452_s30, 4  ;;  %s449_s15 = scalar_lea.sflag [#allocation4], %s2294_s13  ;;  %s2410_s24 = int_to_ptr.vmem [resolvable:$true] %s459_s24 }
  0xaf   : > { %s1881_s8 = scalar_lea.hbm %s2407_s25, 128  ;;  %s1886_s19 = scalar_lea.hbm %s2666_s0, 256 }
  0xb0   : > { %p1882_p8 = scmp.ne.s32.totalorder %s2407_s25, %s1881_s8  ;;  %p1887_p4 = scmp.lt.u32.totalorder %s2407_s25, %s2666_s0 }
  0xb1   : > { %p1888_p12 = scmp.lt.u32.totalorder %s1886_s19, %s1881_s8  ;;  %p1890_p9 = scmp.lt.u32.totalorder %s1881_s8, %s2407_s25 }
  0xb2   : > { %p1884_p1 = pnand %p1882_p8, %p2327_p6 }
  0xb3   : > { %p1889_p3 = por %p1888_p12, %p1887_p4 }
  0xb4   : > { %p1885_p13 = pneg %p1884_p1 }
  0xb5   : > { %p1891_p0 = por %p1890_p9, %p1889_p3 }
  0xb7   : > { %p1892_p2 = pnand %p1891_p0, %p1885_p13 }
  0xb9   : > { %1895 = shalt.err (!%p1892_p2)
}
  0xba   : > { %s1896_s17 = scalar_lea.vmem %s2410_s24, 128  ;;  %s2082_s6 = smov [#allocation3]  }
  0xbb   : > { %p1897_p10 = scmp.ne.s32.totalorder %s2410_s24, %s1896_s17  ;;  %s1901_s26 = sshll.u32 %s2082_s6, 4  ;;  %s1902_s26 = int_to_ptr.vmem [resolvable:$false] %s1901_s26 }
  0xbc   : > { %s1903_s23 = scalar_lea.vmem %s1902_s26, 256  ;;  %p1904_p11 = scmp.lt.s32.totalorder %s2410_s24, %s1902_s26 }
  0xbd   : > { %p1899_p5 = pnand %p1897_p10, %p2327_p6  ;;  %p1905_p8 = scmp.lt.s32.totalorder %s1903_s23, %s1896_s17 }
  0xbf   : > { %p1900_p7 = pneg %p1899_p5  ;;  %p1906_p1 = por %p1905_p8, %p1904_p11 }
  0xc1   : > { %p1907_p4 = pnand %p1906_p1, %p1900_p7 }
  0xc3   : > { %1910 = shalt.err (!%p1907_p4)
}
  0xc4   : > { %p2736_p13 = scmp.ne.s32.totalorder %s2728_s14, 0  ;;  %s2443_s16 = scalar_lea.hbm %s2668_s2, %s2300_s12 }
  0xc5   : > { %s494_s10 = scalar_lea.vmem [#allocation8], %s2297_s28  ;;  %s1401_s4 = sshll.u32 %s2294_s13, 4 }
  0xc6   : > { %1620 = dma.hbm_to_vmem [thread:$0]  (!%p2736_p13), %s2407_s25, 128, %s2410_s24, %s449_s15, %s2733_s29, %s2733_s29, %s2732_s11  }
  0xc7   : > { %s501_s19 = sshll.u32 %s494_s10, 4  ;;  %s1911_s1 = scalar_lea.hbm %s2443_s16, 128  ;;  %s2446_s19 = int_to_ptr.vmem [resolvable:$true] %s501_s19 }
  0xc8   : > { %p1912_p12 = scmp.ne.s32.totalorder %s2443_s16, %s1911_s1  ;;  %s1916_s15 = scalar_lea.hbm %s2668_s2, 256 }
  0xc9   : > { %p1917_p0 = scmp.lt.u32.totalorder %s2443_s16, %s2668_s2  ;;  %p1918_p2 = scmp.lt.u32.totalorder %s1916_s15, %s1911_s1 }
  0xca   : > { %p1914_p3 = pnand %p1912_p12, %p2327_p6  ;;  %p1920_p5 = scmp.lt.u32.totalorder %s1911_s1, %s2443_s16 }
  0xcb   : > { %p1919_p10 = por %p1918_p2, %p1917_p0 }
  0xcc   : > { %p1915_p9 = pneg %p1914_p3 }
  0xcd   : > { %p1921_p7 = por %p1920_p5, %p1919_p10 }
  0xcf   : > { %p1922_p11 = pnand %p1921_p7, %p1915_p9 }
  0xd1   : > { %1925 = shalt.err (!%p1922_p11)
}
  0xd2   : > { %s1926_s28 = scalar_lea.vmem %s2446_s19, 128  ;;  %s2083_s6 = smov [#allocation8]  }
  0xd3   : > { %p1927_p8 = scmp.ne.s32.totalorder %s2446_s19, %s1926_s28  ;;  %s1931_s26 = sshll.u32 %s2083_s6, 4  ;;  %s1932_s26 = int_to_ptr.vmem [resolvable:$false] %s1931_s26 }
  0xd4   : > { %s1933_s23 = scalar_lea.vmem %s1932_s26, 256  ;;  %p1934_p12 = scmp.lt.s32.totalorder %s2446_s19, %s1932_s26 }
  0xd5   : > { %p1929_p1 = pnand %p1927_p8, %p2327_p6  ;;  %p1935_p3 = scmp.lt.s32.totalorder %s1933_s23, %s1926_s28 }
  0xd7   : > { %p1930_p4 = pneg %p1929_p1  ;;  %p1936_p0 = por %p1935_p3, %p1934_p12 }
  0xd9   : > { %p1937_p2 = pnand %p1936_p0, %p1930_p4 }
  0xdb   : > { %1940 = shalt.err (!%p1937_p2)
}
  0xdc   : > { %1626 = dma.hbm_to_vmem [thread:$0]  (!%p2736_p13), %s2443_s16, 128, %s2446_s19, %s2321_s5, %s2733_s29, %s2733_s29, %s2732_s11  }
  0xdd   : > { %s1460_s30 = sshll.u32 %s2069_s21, 8  ;;  %s515_s25 = scalar_lea.vmem [#allocation9], %s1401_s4 }
  0xde   : > { %s2478_s1 = scalar_lea.hbm %s2669_s3, %s1460_s30  ;;  %s522_s24 = sshll.u32 %s515_s25, 4  ;;  %s2482_s24 = int_to_ptr.vmem [resolvable:$true] %s522_s24 }
  0xdf   : > { %s2737_s15 = sand.u32 1, %s2073_s22   ;;  %s1941_s17 = scalar_lea.hbm %s2478_s1, 256 }
  0xe0   : > { %s2486_s12 = scalar_lea.sflag [#allocation10], %s2737_s15  ;;  %p1942_p9 = scmp.ne.s32.totalorder %s2478_s1, %s1941_s17 }
  0xe1   : > { %s1946_s13 = scalar_lea.hbm %s2669_s3, 512  ;;  %p1947_p7 = scmp.lt.u32.totalorder %s2478_s1, %s2669_s3 }
  0xe2   : > { %p1944_p10 = pnand %p1942_p9, %p2327_p6  ;;  %p1948_p11 = scmp.lt.u32.totalorder %s1946_s13, %s1941_s17 }
  0xe3   : > { %p1950_p1 = scmp.lt.u32.totalorder %s1941_s17, %s2478_s1 }
  0xe4   : > { %p1945_p5 = pneg %p1944_p10  ;;  %p1949_p8 = por %p1948_p11, %p1947_p7 }
  0xe6   : > { %p1951_p4 = por %p1950_p1, %p1949_p8 }
  0xe8   : > { %p1952_p12 = pnand %p1951_p4, %p1945_p5 }
  0xea   : > { %1955 = shalt.err (!%p1952_p12)
}
  0xeb   : > { %s1956_s19 = scalar_lea.vmem %s2482_s24, 256  ;;  %s2084_s4 = smov [#allocation9]  }
  0xec   : > { %p1957_p3 = scmp.ne.s32.totalorder %s2482_s24, %s1956_s19  ;;  %s1961_s28 = sshll.u32 %s2084_s4, 4  ;;  %s1962_s28 = int_to_ptr.vmem [resolvable:$false] %s1961_s28 }
  0xed   : > { %s1963_s6 = scalar_lea.vmem %s1962_s28, 512  ;;  %p1964_p9 = scmp.lt.s32.totalorder %s2482_s24, %s1962_s28 }
  0xee   : > { %p1959_p0 = pnand %p1957_p3, %p2327_p6  ;;  %p1965_p10 = scmp.lt.s32.totalorder %s1963_s6, %s1956_s19 }
  0xf0   : > { %p1960_p2 = pneg %p1959_p0  ;;  %p1966_p7 = por %p1965_p10, %p1964_p9 }
  0xf2   : > { %p1967_p11 = pnand %p1966_p7, %p1960_p2 }
  0xf4   : > { %1970 = shalt.err (!%p1967_p11)
}
  0xf5   : > { %s2085_s26 = smov 128   ;;  %s2086_s23 = smov 8  }
  0xf6   : > { %1629 = dma.hbm_to_vmem [thread:$0]  (!%p2736_p13), %s2478_s1, 256, %s2482_s24, %s2486_s12, %s2085_s26, %s2085_s26, %s2086_s23  }
  0xf7   : > { %p2738_p6 = scmp.ne.s32.totalorder %s2719_s27, 0 }
  0xf8   : > { %s2739_s20 = sld [smem:[#allocation29_spill]] (!%p2738_p6)  ;;  %s2513_s30 = sand.u32 (!%p2738_p6), 1, %s2057_s18  }
  0xf9   : > { %534 = sbr.rel (%p2738_p6) target bundleno = 798 (0x31e), region = 64  ;;  %s2516_s8 = sshll.u32 (!%p2738_p6), %s2513_s30, 3 }
  0xfa   : > { %s537_s10 = scalar_lea.sflag (!%p2738_p6), [#allocation4], %s2513_s30  ;;  %s540_s25 = scalar_lea.vmem (!%p2738_p6), [#allocation3], %s2516_s8 }
  0xfe   : > { %p2740_p5 = scmp.ne.s32.totalorder (!%p2738_p6), %s2739_s20, 0 }
 0x100   : > { %2024 = dma.done.wait (%p2740_p5), %s537_s10, 128  }
 0x101   : > { %2026 = vsyncadd (%p2740_p5), %s537_s10, 4294967168  ;;  %s2741_s14 = sld [smem:[#allocation28_spill]]  ;;  %s549_s24 = scalar_lea.vmem [#allocation6], %s2516_s8 }
 0x107   : > { %s545_s27 = sand.u32 1, %s2741_s14  }
 0x108   : > { %s546_s1 = scalar_lea.sflag [#allocation7], %s545_s27 }
 0x109   : > { %2028 = dma.done.wait (%p2740_p5), %s546_s1, 256  }
 0x10a   : > { %2030 = vsyncadd (%p2740_p5), %s546_s1, 4294967040  ;;  %s1408_s15 = sshll.u32 %s2513_s30, 4  ;;  %s558_s12 = scalar_lea.vmem [#allocation8], %s2516_s8 }
 0x10b   : > { %s564_s17 = scalar_lea.sflag [#allocation10], %s545_s27  ;;  %s2534_s5 = scalar_lea.vmem [#allocation9], %s1408_s15 }
 0x10c   : > { %2032 = dma.done.wait (%p2740_p5), %s564_s17, 256  }
 0x10d   : > { %2034 = vsyncadd (%p2740_p5), %s564_s17, 4294967040  ;;  %p2742_p13 = scmp.eq.s32.totalorder %s2741_s14, 0 }
 0x10f   : > { %2036 = dma.done.wait (%p2742_p13), [#allocation10], 1024   ;;  %p2743_p8 = pmov %p2742_p13 }
 0x111   : > { %2038 = vsyncadd (%p2743_p8), [#allocation10], 4294966272  ;;  %p2744_p1 = pmov %p2743_p8 }
 0x113   : > { %2040 = dma.done.wait (%p2744_p1), [#allocation13], 2048   ;;  %p2745_p4 = pmov %p2744_p1 }
 0x114   : > { %p2746_p12 = pmov %p2744_p1 }
 0x115   : > { %2042 = vsyncadd (%p2745_p4), [#allocation13], 4294965248 }
 0x116   : > { %2044 = dma.done.wait (%p2746_p12), [#allocation16], 1024   ;;  %p2747_p3 = pmov %p2744_p1 }
 0x117   : > { %v2087_v0 = vmov 0.0   ;;  %vm2088_vm0 = vmmov 0   ;;  %v1704_v1 = vld [vmem:[#allocation12] sm:$0xff]   ;;  %v1706_v3 = vld [vmem:[#allocation12 + $0x8] sm:$0xff]   ;;  %v1708_v5 = vld [vmem:[#allocation12 + $0x10] sm:$0xff]   ;;  %s2748_s29 = sld [smem:[#allocation37_spill]] }
 0x118   : > { %2046 = vsyncadd (%p2747_p3), [#allocation16], 4294966272  ;;  %1498 = vmatprep.subr.bf16.mxu0 %v2087_v0  ;;  %1518 = vmatprep.subr.bf16.mxu1 %v2087_v0  ;;  %v1705_v2 = vld [vmem:[#allocation11] sm:$0xff]   ;;  %v1707_v4 = vld [vmem:[#allocation11 + $0x8] sm:$0xff]   ;;  %s2749_s4 = sld [smem:[#allocation38_spill]]  ;;  %s2750_s28 = sld [smem:[#allocation27_spill]] }
 0x119   : > { %1514 = vmatprep.mubr.msk.bf16.mxu0 %vm2088_vm0, %v2087_v0  ;;  %1534 = vmatprep.mubr.msk.bf16.mxu1 %vm2088_vm0, %v2087_v0  ;;  %v1709_v6 = vld [vmem:[#allocation11 + $0x10] sm:$0xff]   ;;  %v1710_v7 = vld [vmem:[#allocation12 + $0x18] sm:$0xff]   ;;  %v1712_v9 = vld [vmem:[#allocation12 + $0x20] sm:$0xff]   ;;  %s2751_s23 = sld [smem:[#allocation39_spill]]  ;;  %s642_s20 = scalar_lea.vmem [#allocation17], %s1408_s15 }
 0x11a   : > { %1499 = vmatpush3.bf16.msra.mxu0 %v1704_v1  ;;  %1519 = vmatpush3.bf16.msra.mxu1 %v1705_v2  ;;  %v1711_v8 = vld [vmem:[#allocation11 + $0x18] sm:$0xff]   ;;  %v1713_v10 = vld [vmem:[#allocation11 + $0x20] sm:$0xff]   ;;  %v1714_v11 = vld [vmem:[#allocation12 + $0x28] sm:$0xff]   ;;  %s1165_s8 = sshll.u32 %s642_s20, 4  ;;  %s2752_s10 = sld [smem:[#allocation32_spill]]  ;;  %s2612_s8 = int_to_ptr.vmem [resolvable:$true] %s1165_s8 }
 0x11b   : > { %1500 = vmatprep.subr.bf16.mxu0 %v2087_v0  ;;  %1520 = vmatprep.subr.bf16.mxu1 %v2087_v0  ;;  %v1715_v12 = vld [vmem:[#allocation11 + $0x28] sm:$0xff]   ;;  %v1716_v13 = vld [vmem:[#allocation12 + $0x30] sm:$0xff]   ;;  %v1718_v15 = vld [vmem:[#allocation12 + $0x38] sm:$0xff]   ;;  %s2753_s1 = sld [smem:[#allocation40_spill]]  ;;  %s1152_s15 = scalar_lea.sflag [#allocation5], %s2513_s30 }
 0x11c   : > { %v1717_v14 = vld [vmem:[#allocation11 + $0x30] sm:$0xff]   ;;  %v1719_v16 = vld [vmem:[#allocation11 + $0x38] sm:$0xff]   ;;  %v1720_v17 = vld [vmem:[%s549_s24] sm:$0xff]   ;;  %s2089_s17 = smov [#allocation17]  }
 0x11d   : > { %v1721_v18 = vld [vmem:[%s540_s25] sm:$0xff]   ;;  %v1722_v19 = vld [vmem:[#allocation14] sm:$0xff]   ;;  %v1723_v20 = vld [vmem:[#allocation14 + $0x8] sm:$0xff]  }
 0x11e   : > { %1501 = vmatpush3.bf16.msra.mxu0 %v1706_v3  ;;  %1521 = vmatpush3.bf16.msra.mxu1 %v1707_v4  ;;  %v1724_v21 = vld [vmem:[#allocation14 + $0x10] sm:$0xff]   ;;  %v1725_v22 = vld [vmem:[#allocation14 + $0x18] sm:$0xff]   ;;  %v1726_v23 = vld [vmem:[#allocation14 + $0x20] sm:$0xff]   ;;  %s1461_s25 = sshll.u32 %s2750_s28, 8 }
 0x11f   : > { %1502 = vmatprep.subr.bf16.mxu0 %v2087_v0  ;;  %1522 = vmatprep.subr.bf16.mxu1 %v2087_v0  ;;  %v1727_v24 = vld [vmem:[#allocation14 + $0x28] sm:$0xff]   ;;  %v1728_v25 = vld [vmem:[#allocation14 + $0x30] sm:$0xff]   ;;  %v1729_v26 = vld [vmem:[#allocation14 + $0x38] sm:$0xff]  }
 0x120   : > { %v1730_v27 = vld [vmem:[%s558_s12] sm:$0xff]   ;;  %v1731_v28 = vld [vmem:[#allocation15] sm:$0xff]   ;;  %v1732_v29 = vld [vmem:[#allocation15 + $0x8] sm:$0xff]   ;;  %s1971_s12 = scalar_lea.vmem %s2612_s8, 256  ;;  %p2754_p2 = scmp.ne.s32.totalorder %s2752_s10, 0 }
 0x121   : > { %v1733_v30 = vld [vmem:[#allocation15 + $0x10] sm:$0xff]   ;;  %v1734_v31 = vld [vmem:[#allocation15 + $0x18] sm:$0xff]   ;;  %v1735_v32 = vld [vmem:[#allocation15 + $0x20] sm:$0xff]   ;;  %s2617_s24 = scalar_lea.hbm %s2753_s1, %s1461_s25  ;;  %p1972_p0 = scmp.ne.s32.totalorder %s2612_s8, %s1971_s12 }
 0x122   : > { %1503 = vmatpush3.bf16.msra.mxu0 %v1708_v5  ;;  %1523 = vmatpush3.bf16.msra.mxu1 %v1709_v6  ;;  %v1736_v33 = vld [vmem:[#allocation15 + $0x28] sm:$0xff]   ;;  %v1737_v34 = vld [vmem:[#allocation15 + $0x30] sm:$0xff]   ;;  %v1738_v35 = vld [vmem:[#allocation15 + $0x38] sm:$0xff]  }
 0x123   : > { %1504 = vmatprep.subr.bf16.mxu0 %v2087_v0  ;;  %1524 = vmatprep.subr.bf16.mxu1 %v2087_v0  ;;  %v1432_v46 = vld [vmem:[%s2748_s29] ss:$0 sm:$0xff]  ;;  %v1146_v1 = vld [vmem:[%s2534_s5 + $0x8] sm:$0xff]  ;;  %p1973_p9 = pnand %p1972_p0, %p2754_p2 }
 0x124   : > { %v1433_v47 = vld [vmem:[%s2749_s4] ss:$0 sm:$0xff] }
 0x125   : > { %v1451_v59 = vld [vmem:[%s2751_s23] ss:$0 sm:$0xff]  ;;  %p1974_p10 = pneg %p1973_p9 }
 0x126   : > { %1505 = vmatpush3.bf16.msra.mxu0 %v1710_v7  ;;  %1525 = vmatpush3.bf16.msra.mxu1 %v1711_v8  ;;  %v1145_v61 = vld [vmem:[%s2534_s5] sm:$0xff]  ;;  %s1975_s5 = sshll.u32 %s2089_s17, 4  ;;  %s1976_s5 = int_to_ptr.vmem [resolvable:$false] %s1975_s5 }
 0x127   : > { %1506 = vmatprep.subr.bf16.mxu0 %v2087_v0  ;;  %1526 = vmatprep.subr.bf16.mxu1 %v2087_v0  ;;  %s1977_s11 = scalar_lea.vmem %s1976_s5, 512  ;;  %p1978_p7 = scmp.lt.s32.totalorder %s2612_s8, %s1976_s5 }
 0x128   : > { %p1979_p11 = scmp.lt.s32.totalorder %s1977_s11, %s1971_s12 }
 0x12a   : > { %1507 = vmatpush3.bf16.msra.mxu0 %v1712_v9  ;;  %1527 = vmatpush3.bf16.msra.mxu1 %v1713_v10  ;;  %p1980_p6 = por %p1979_p11, %p1978_p7 }
 0x12b   : > { %1508 = vmatprep.subr.bf16.mxu0 %v2087_v0  ;;  %1528 = vmatprep.subr.bf16.mxu1 %v2087_v0 }
 0x12c   : > { %p1981_p5 = pnand %p1980_p6, %p1974_p10 }
 0x12e   : > { %1509 = vmatpush3.bf16.msra.mxu0 %v1714_v11  ;;  %1529 = vmatpush3.bf16.msra.mxu1 %v1715_v12 }
 0x12f   : > { %1510 = vmatprep.subr.bf16.mxu0 %v2087_v0  ;;  %1530 = vmatprep.subr.bf16.mxu1 %v2087_v0 }
 0x132   : > { %1511 = vmatpush3.bf16.msra.mxu0 %v1716_v13  ;;  %1531 = vmatpush3.bf16.msra.mxu1 %v1717_v14 }
 0x133   : > { %1512 = vmatprep.subr.bf16.mxu0 %v2087_v0  ;;  %1532 = vmatprep.subr.bf16.mxu1 %v2087_v0 }
 0x136   : > { %1513 = vmatpush3.bf16.msra.mxu0 %v1718_v15  ;;  %1533 = vmatpush3.bf16.msra.mxu1 %v1719_v16 }
 0x137   : > { %1538 = vmatprep.subr.bf16.mxu0 %v2087_v0  ;;  %1558 = vmatprep.subr.bf16.mxu1 %v2087_v0 }
 0x139   : > { %1515 = vmatmul.mubr.bf16.vlgmr.msra.gmra.mrb[0].mxu0 %v1720_v17  ;;  %1535 = vmatmul.mubr.bf16.vlgmr.msra.gmra.mrb[0].mxu1 %v1721_v18 }
 0x13a   : > { %1539 = vmatpush3.bf16.msra.mxu0 %v1722_v19  ;;  %1554 = vmatprep.mubr.msk.bf16.mxu0 %vm2088_vm0, %v2087_v0 }
 0x13b   : > { %1540 = vmatprep.subr.bf16.mxu0 %v2087_v0  ;;  %1574 = vmatprep.mubr.msk.bf16.mxu1 %vm2088_vm0, %v2087_v0 }
 0x13c   : > { %1559 = vmatpush3.bf16.msra.mxu1 %v1731_v28 }
 0x13d   : > { %1560 = vmatprep.subr.bf16.mxu1 %v2087_v0 }
 0x13e   : > { %1541 = vmatpush3.bf16.msra.mxu0 %v1723_v20 }
 0x13f   : > { %1542 = vmatprep.subr.bf16.mxu0 %v2087_v0 }
 0x140   : > { %1561 = vmatpush3.bf16.msra.mxu1 %v1732_v29 }
 0x141   : > { %1562 = vmatprep.subr.bf16.mxu1 %v2087_v0 }
 0x142   : > { %1543 = vmatpush3.bf16.msra.mxu0 %v1724_v21 }
 0x143   : > { %1544 = vmatprep.subr.bf16.mxu0 %v2087_v0 }
 0x144   : > { %1563 = vmatpush3.bf16.msra.mxu1 %v1733_v30 }
 0x145   : > { %1564 = vmatprep.subr.bf16.mxu1 %v2087_v0 }
 0x146   : > { %1545 = vmatpush3.bf16.msra.mxu0 %v1725_v22 }
 0x147   : > { %1546 = vmatprep.subr.bf16.mxu0 %v2087_v0 }
 0x148   : > { %1565 = vmatpush3.bf16.msra.mxu1 %v1734_v31 }
 0x149   : > { %1566 = vmatprep.subr.bf16.mxu1 %v2087_v0 }
 0x14a   : > { %1547 = vmatpush3.bf16.msra.mxu0 %v1726_v23 }
 0x14b   : > { %1548 = vmatprep.subr.bf16.mxu0 %v2087_v0 }
 0x14c   : > { %1567 = vmatpush3.bf16.msra.mxu1 %v1735_v32 }
 0x14d   : > { %1568 = vmatprep.subr.bf16.mxu1 %v2087_v0 }
 0x14e   : > { %1549 = vmatpush3.bf16.msra.mxu0 %v1727_v24 }
 0x14f   : > { %1550 = vmatprep.subr.bf16.mxu0 %v2087_v0 }
 0x150   : > { %1569 = vmatpush3.bf16.msra.mxu1 %v1736_v33 }
 0x151   : > { %1570 = vmatprep.subr.bf16.mxu1 %v2087_v0 }
 0x152   : > { %1551 = vmatpush3.bf16.msra.mxu0 %v1728_v25 }
 0x153   : > { %1552 = vmatprep.subr.bf16.mxu0 %v2087_v0 }
 0x154   : > { %1571 = vmatpush3.bf16.msra.mxu1 %v1737_v34 }
 0x155   : > { %1572 = vmatprep.subr.bf16.mxu1 %v2087_v0 }
 0x156   : > { %1553 = vmatpush3.bf16.msra.mxu0 %v1729_v26 }
 0x158   : > { %1573 = vmatpush3.bf16.msra.mxu1 %v1738_v35 }
 0x159   : > { %1555 = vmatmul.mubr.bf16.vlgmr.msra.gmra.mrb[4].mxu0 %v1730_v27 }
 0x20c   : > { %v786_v36 = vpop.f32.mrb[0].mxu0  ;;  %v881_v37 = vpop.f32.mrb[0].mxu1 }
 0x20d   : > { %v1516_v38 = vpop.f32.mrb[1].mxu0  ;;  %v882_v39 = vadd.f32 %v881_v37, %v786_v36  ;;  %v1536_v40 = vpop.f32.mrb[1].mxu1 }
 0x20e   : > { %v789_v41 = vpop.f32.mrb[2].mxu0  ;;  %v884_v42 = vpop.f32.mrb[2].mxu1 }
 0x20f   : > { %v1517_v43 = vpop.f32.mrb[3].mxu0  ;;  %v885_v44 = vadd.f32 %v884_v42, %v789_v41  ;;  %v1537_v45 = vpop.f32.mrb[3].mxu1  ;;  %v895_v49 = vadd.f32 %v1432_v46, %v882_v39 }
 0x211   : > { %v896_v53 = vadd.f32 %v1432_v46, %v885_v44 }
 0x22c   : > { %v1010_v48 = vpop.f32.mrb[4].mxu0 }
 0x22d   : > { %v1011_v50 = vadd.f32 %v1433_v47, %v1010_v48  ;;  %v1556_v51 = vpop.f32.mrb[5].mxu0 }
 0x22e   : > { %v1013_v52 = vpop.f32.mrb[6].mxu0 }
 0x22f   : > { %v1017_v54 = vmul.f32 %v1011_v50, %v895_v49  ;;  %v1014_v55 = vadd.f32 %v1433_v47, %v1013_v52  ;;  %v1557_v56 = vpop.f32.mrb[7].mxu0 }
 0x231   : > { %v1018_v57 = vmul.f32 %v1014_v55, %v896_v53 }
 0x233   : > { %v1019_v58 = vpack.c.bf16 %v1018_v57, %v1017_v54 }
 0x235   : > { %1575 = vmatmul.mubr.bf16.vlgmr.msra.gmra.mrb[4].mxu1 %v1019_v58 }
 0x308   : > { %v1120_v60 = vpop.f32.mrb[4].mxu1 }
 0x309   : > { %v1143_v62 = vadd.f32 %v1451_v59, %v1120_v60  ;;  %v1576_v63 = vpop.f32.mrb[5].mxu1 }
 0x30a   : > { %v1123_v0 = vpop.f32.mrb[6].mxu1 }
 0x30b   : > { %v1147_v2 = vadd.f32 %v1145_v61, %v1143_v62  ;;  %v1144_v3 = vadd.f32 %v1451_v59, %v1123_v0  ;;  %v1577_v4 = vpop.f32.mrb[7].mxu1 }
 0x30d   : > { %1149 = vst [vmem:[%s642_s20] sm:$0xff] %v1147_v2  ;;  %v1148_v5 = vadd.f32 %v1146_v1, %v1144_v3 }
 0x30f   : > { %1150 = vst [vmem:[%s642_s20 + $0x8] sm:$0xff] %v1148_v5 }
 0x310   : > { %1984 = shalt.err (!%p1981_p5)
}
 0x311   : > { %s1985_s13 = scalar_lea.hbm %s2617_s24, 256  ;;  %s1989_s19 = scalar_lea.hbm %s2753_s1, 512 }
 0x312   : > { %p1986_p13 = scmp.ne.s32.totalorder %s2617_s24, %s1985_s13  ;;  %p1990_p4 = scmp.lt.u32.totalorder %s2617_s24, %s2753_s1 }
 0x313   : > { %p1991_p12 = scmp.lt.u32.totalorder %s1989_s19, %s1985_s13  ;;  %p1993_p0 = scmp.lt.u32.totalorder %s1985_s13, %s2617_s24 }
 0x314   : > { %p1987_p8 = pnand %p1986_p13, %p2754_p2 }
 0x315   : > { %p1992_p3 = por %p1991_p12, %p1990_p4 }
 0x316   : > { %p1988_p1 = pneg %p1987_p8 }
 0x317   : > { %p1994_p9 = por %p1993_p0, %p1992_p3 }
 0x319   : > { %p1995_p10 = pnand %p1994_p9, %p1988_p1 }
 0x31b   : > { %1998 = shalt.err (!%p1995_p10)
}
 0x31c   : > { %s2090_s6 = smov 128   ;;  %s2091_s26 = smov 8  }
 0x31d   : > { %1602 = dma.vmem_to_hbm [thread:$0]  (%p2754_p2), %s2612_s8, 256, %s2617_s24, %s1152_s15, %s2090_s6, %s2090_s6, %s2091_s26  }
 0x31e PF: > { %s2755_s23 = sld [smem:[#allocation25_spill]]  ;;  %s2756_s20 = sld [smem:[#allocation30_spill]] }
 0x31f   : > { %p2758_p11 = scmp.ge.s32.totalorder %s2073_s22, 2 }
 0x324   : > { %s1180_s25 = sand.u32 1, %s2755_s23   ;;  %p2757_p7 = scmp.ne.s32.totalorder %s2756_s20, 0 }
 0x325   : > { %s1181_s14 = scalar_lea.sflag [#allocation5], %s1180_s25 }
 0x326   : > { %p1631_p6 = pnand %p2758_p11, %p2757_p7 }
 0x328   : > { %2048 = dma.done.wait (!%p1631_p6), %s1181_s14, 256  }
 0x329   : > { %2050 = vsyncadd (!%p1631_p6), %s1181_s14, 4294967040  ;;  %s35_s22 = sadd.s32 1, %s2073_s22   ;;  %s2759_s27 = sld [smem:[#allocation26_spill]] }
 0x32a   : > { %p32_p5 = scmp.ge.s32.totalorder %s35_s22, 4   ;;  %s2760_s19 = sld [smem:[#allocation33_spill]] }
 0x32b   : > { %s2761_s30 = sld [smem:[#allocation31_spill]]  ;;  %s2762_s17 = smov %s2057_s18 }
 0x32c   : > { %s2764_s20 = smov %s2069_s21  ;;  %34 = sbr.rel (!%p32_p5) target bundleno = 20 (0x14), region = 180 }
 0x32f   : > { %s2763_s18 = smov %s2759_s27 }
 0x331   : > { %s2765_s21 = smov %s2761_s30 }
 0x333   :  { %1186 = vsyncpa [#allocation4], 1 }
 0x334   :  { %1188 = vsyncpa [#allocation4 + $0x1], 1 }
 0x335   :  { %1189 = vsyncpa [#allocation7], 1 }
 0x336   :  { %1191 = vsyncpa [#allocation7 + $0x1], 1 }
 0x337   :  { %1192 = vsyncpa [#allocation10], 1 }
 0x338   :  { %1194 = vsyncpa [#allocation10 + $0x1], 1 }
 0x339   :  { %1195 = vsyncpa [#allocation13], 1 }
 0x33a   :  { %1196 = vsyncpa [#allocation16], 1 }
 0x33b   :  { %1197 = vsyncpa [#allocation5], 1 }
 0x33c   :  { %1199 = vsyncpa [#allocation5 + $0x1], 1 }

</bundles_post_ra>
